<compile_context>
chip_gen: v5e
topology: v5e:2x2
jax: 0.10.0
libtpu: 0.0.40
codegen_flags: <defaults>
</compile_context>

<pallas_src>
import functools

import jax
import jax.numpy as jnp
import numpy as np
from jax.experimental import pallas as pl
from jax.experimental.pallas import tpu as pltpu

EPS = 1e-5
SUBLANE = 8  # f32 sublane tile


def _round_up(x, m):
    return -(-x // m) * m


def _tap_masks(N, H, W, kh, kw, pad):
    """Static per-tap lane shifts + validity masks (masks also encode zero padding).

    Output position i on the fused lane axis (i = n*H*W + h*W + w) reads input at
    i + (dy-pad)*W + (dx-pad); any read that leaves the HxW window of its own
    sample is masked to zero, so sample-boundary / array-boundary wraps of the
    lane roll never leak data.
    """
    HW = H * W
    L = N * HW
    pos = np.arange(L)
    hh = (pos // W) % H
    ww = pos % W
    shifts = []
    masks = np.empty((kh * kw, 1, L), np.float32)
    for dy in range(kh):
        for dx in range(kw):
            oy, ox = dy - pad, dx - pad
            shifts.append(int((-(oy * W + ox)) % L))
            valid = ((hh + oy >= 0) & (hh + oy < H) &
                     (ww + ox >= 0) & (ww + ox < W))
            masks[dy * kw + dx, 0, :] = valid.astype(np.float32)
    return tuple(shifts), jnp.asarray(masks)


def _double_conv_kernel(x_ref, masks_ref, w1_ref, g1_ref, be1_ref,
                        w2_ref, g2_ref, be2_ref, o_ref, stack1_ref, stack2_ref,
                        *, N, HW, Cp1, Cp2, shifts):
    """Fused double_conv (2x [conv -> BN(batch stats) -> ReLU]).

    x_ref:      (Cp1, N*H*W)        f32  pre-fused lane layout, channels zero-padded to Cp1
    masks_ref:  (kh*kw, 1, N*H*W)   f32  per-tap validity / zero-padding masks
    w*_ref:     (Cout, kh*kw*Cp)    bf16 tap-major stacked conv weights (channel-padded)
    g*_ref / be*_ref: (Cout, 1)     f32  BN gamma / beta
    o_ref:      (N, Cout, H*W)      f32  NCHW output (flattened spatial)
    stack*_ref: (kh*kw*Cp, N*H*W)   f32  VMEM scratch for the fused-K matmul operand
    """
    n_taps = len(shifts)
    L = N * HW
    inv_l = 1.0 / L
    # Hoisted once, reused by both blocks.
    masks = [masks_ref[t] for t in range(n_taps)]                  # (1, L) f32 each

    def conv_bn_relu(feat, Cp, stack_ref, w_ref, g_ref, be_ref):
        # feat: (Cp, L) f32.  Build the fused-K operand: per-tap rolled+masked slabs
        # written at 8-row-aligned sublane offsets (f32 tile aligned -> no relayout).
        for t in range(n_taps):
            s = shifts[t]
            shifted = pltpu.roll(feat, s, 1) if s else feat        # XLU lane roll
            stack_ref[t * Cp:(t + 1) * Cp, :] = shifted * masks[t]
        # Single cast, single MXU matmul: (Cout, taps*Cp) @ (taps*Cp, L), f32 accum.
        stacked = stack_ref[...].astype(jnp.bfloat16)
        acc = jnp.dot(w_ref[...], stacked,
                      preferred_element_type=jnp.float32)          # (Cout, L) f32
        # BatchNorm2d, training mode: per-channel stats over N*H*W, biased variance.
        # Single-pass stats; mean folded into the affine.  Conv bias folds out exactly.
        mean = jnp.sum(acc, axis=1, keepdims=True) * inv_l          # (Cout, 1)
        ex2 = jnp.sum(acc * acc, axis=1, keepdims=True) * inv_l
        var = ex2 - mean * mean
        scale = g_ref[...] * jax.lax.rsqrt(var + EPS)               # (Cout, 1)
        shift = be_ref[...] - mean * scale
        return jnp.maximum(acc * scale + shift, 0.0)                # ReLU, (Cout, L) f32

    h1 = conv_bn_relu(x_ref[...], Cp1, stack1_ref, w1_ref, g1_ref, be1_ref)
    h2 = conv_bn_relu(h1, Cp2, stack2_ref, w2_ref, g2_ref, be2_ref)
    for n in range(N):                                              # 256-aligned lane slices
        o_ref[n] = h2[:, n * HW:(n + 1) * HW]
    # TODO(synk): BatchNorm running_mean/var (momentum) updates are module-state side
    # effects of PyTorch training mode and are not produced by this functional forward.


def inconv_forward(x_nchw, params_oihw, padding):
    """double_conv forward.  x_nchw: (N, Cin, H, W) f32 -> (N, Cout, H, W) f32."""
    N, Cin, H, W = x_nchw.shape
    (w1, _b1, g1, be1), (w2, _b2, g2, be2) = params_oihw   # conv biases: exact no-ops here
    Cout = int(w1.shape[0])
    kh, kw = int(w1.shape[2]), int(w1.shape[3])
    HW = H * W
    L = N * HW
    n_taps = kh * kw
    assert HW % 128 == 0, "spatial extent must be lane-dense for this toy kernel"
    assert Cout % SUBLANE == 0, "Cout must be a sublane-tile multiple for the fused-K stack"
    Cp1 = _round_up(Cin, SUBLANE)   # block-1 feature rows (padded)
    Cp2 = Cout                      # block-2 feature rows (h1 is already Cout rows)

    shifts, masks = _tap_masks(N, H, W, kh, kw, padding)

    def stacked_weight(w, Cp):
        # OIHW (O, I, kh, kw) -> tap-major, channel-padded, bf16: (O, n_taps*Cp)
        O, I = int(w.shape[0]), int(w.shape[1])
        wt = jnp.transpose(w, (2, 3, 0, 1)).reshape(n_taps, O, I)      # (taps, O, I)
        wt = jnp.pad(wt, ((0, 0), (0, 0), (0, Cp - I)))                # (taps, O, Cp)
        return jnp.transpose(wt, (1, 0, 2)).reshape(O, n_taps * Cp).astype(jnp.bfloat16)

    # Pre-fused lane layout (Cin on sublanes, N*H*W on lanes), channel-padded to Cp1.
    x_fused = jnp.transpose(x_nchw, (1, 0, 2, 3)).reshape(Cin, L).astype(jnp.float32)
    x_fused = jnp.pad(x_fused, ((0, Cp1 - Cin), (0, 0)))

    kernel = functools.partial(_double_conv_kernel, N=N, HW=HW,
                               Cp1=Cp1, Cp2=Cp2, shifts=shifts)
    vmem = pl.BlockSpec(memory_space=pltpu.MemorySpace.VMEM)
    out = pl.pallas_call(
        kernel,
        out_shape=jax.ShapeDtypeStruct((N, Cout, HW), jnp.float32),
        in_specs=[vmem] * 8,
        out_specs=vmem,
        scratch_shapes=[pltpu.VMEM((n_taps * Cp1, L), jnp.float32),
                        pltpu.VMEM((n_taps * Cp2, L), jnp.float32)],
    )(x_fused, masks,
      stacked_weight(w1, Cp1), g1.reshape(Cout, 1), be1.reshape(Cout, 1),
      stacked_weight(w2, Cp2), g2.reshape(Cout, 1), be2.reshape(Cout, 1))
    # NCHW comes straight out of the kernel; this reshape is metadata-only.
    return out.reshape(N, Cout, H, W)


# ---------------------------------------------------------------------------
# Pure-JAX reference (silent correctness check; includes the conv bias).
# ---------------------------------------------------------------------------
def _ref_block(x_nchw, w_oihw, b, g, beta, padding):
    y = jax.lax.conv_general_dilated(
        x_nchw, w_oihw, window_strides=(1, 1),
        padding=[(padding, padding), (padding, padding)],
        dimension_numbers=('NCHW', 'OIHW', 'NCHW'))
    y = y + b[None, :, None, None]
    mean = y.mean(axis=(0, 2, 3), keepdims=True)
    var = ((y - mean) ** 2).mean(axis=(0, 2, 3), keepdims=True)
    y = (y - mean) / jnp.sqrt(var + EPS)
    y = y * g[None, :, None, None] + beta[None, :, None, None]
    return jnp.maximum(y, 0.0)


def _ref_forward(x_nchw, params_oihw, padding):
    (w1, b1, g1, be1), (w2, b2, g2, be2) = params_oihw
    y = _ref_block(x_nchw, w1, b1, g1, be1, padding)
    return _ref_block(y, w2, b2, g2, be2, padding)


def make_params(key, inC, outC, kernel_size):
    """Deterministic synthetic parameters: (conv W OIHW, conv b, BN gamma, BN beta) x 2."""
    keys = jax.random.split(key, 8)

    def block(kw_, kb_, kg_, kbe_, cin, cout):
        fan_in = cin * kernel_size * kernel_size
        bound = 1.0 / np.sqrt(fan_in)
        w = jax.random.uniform(kw_, (cout, cin, kernel_size, kernel_size),
                               jnp.float32, -bound, bound)            # OIHW
        b = jax.random.uniform(kb_, (cout,), jnp.float32, -bound, bound)
        gamma = jax.random.uniform(kg_, (cout,), jnp.float32, 0.5, 1.5)
        beta = jax.random.uniform(kbe_, (cout,), jnp.float32, -0.5, 0.5)
        return w, b, gamma, beta

    return (block(keys[0], keys[1], keys[2], keys[3], inC, outC),
            block(keys[4], keys[5], keys[6], keys[7], outC, outC))


if __name__ == "__main__":
    # inconv(inC=4, outC=8, kernel_size=3, padding=1, momentum=0.1)
    inC, outC, kernel_size, padding = 4, 8, 3, 1
    N, H, W = 2, 16, 16

    key = jax.random.PRNGKey(0)
    kx, kp = jax.random.split(key)
    x = jax.random.normal(kx, (N, inC, H, W), jnp.float32)    # NCHW, like PyTorch

    params = make_params(kp, inC, outC, kernel_size)

    fwd = jax.jit(inconv_forward, static_argnums=(2,))
    out = jax.block_until_ready(fwd(x, params, padding))

    ref = jax.block_until_ready(_ref_forward(x, params, padding))
    assert out.shape == (N, outC, H, W)
    # Tolerance covers bf16 MXU operands (accumulation and BN math stay f32).
    assert np.allclose(np.asarray(out), np.asarray(ref), atol=2e-2, rtol=2e-2)

    print("KERNEL_OK")
</pallas_src>

<mosaic_0001>
module attributes {stable_mosaic.version = 11 : i64} {
  func.func @_double_conv_kernel(%arg0: memref<8x512xf32, #tpu.memory_space<vmem>>, %arg1: memref<9x1x512xf32, #tpu.memory_space<vmem>>, %arg2: memref<8x72xbf16, #tpu.memory_space<vmem>>, %arg3: memref<8x1xf32, #tpu.memory_space<vmem>>, %arg4: memref<8x1xf32, #tpu.memory_space<vmem>>, %arg5: memref<8x72xbf16, #tpu.memory_space<vmem>>, %arg6: memref<8x1xf32, #tpu.memory_space<vmem>>, %arg7: memref<8x1xf32, #tpu.memory_space<vmem>>, %arg8: memref<2x8x256xf32, #tpu.memory_space<vmem>>, %arg9: memref<72x512xf32, #tpu.memory_space<vmem>>, %arg10: memref<72x512xf32, #tpu.memory_space<vmem>>) attributes {dimension_semantics = [], scalar_prefetch = 0 : i64, scratch_operands = 2 : i64, tpu.core_type = #tpu.core_type<tc>} {
    %c0 = arith.constant 0 : index
    %c0_0 = arith.constant 0 : index
    %c0_1 = arith.constant 0 : index
    %0 = vector.load %arg1[%c0, %c0_0, %c0_1] : memref<9x1x512xf32, #tpu.memory_space<vmem>>, vector<1x1x512xf32>
    %1 = vector.shape_cast %0 : vector<1x1x512xf32> to vector<1x512xf32>
    %c1 = arith.constant 1 : index
    %c0_2 = arith.constant 0 : index
    %c0_3 = arith.constant 0 : index
    %2 = vector.load %arg1[%c1, %c0_2, %c0_3] : memref<9x1x512xf32, #tpu.memory_space<vmem>>, vector<1x1x512xf32>
    %3 = vector.shape_cast %2 : vector<1x1x512xf32> to vector<1x512xf32>
    %c2 = arith.constant 2 : index
    %c0_4 = arith.constant 0 : index
    %c0_5 = arith.constant 0 : index
    %4 = vector.load %arg1[%c2, %c0_4, %c0_5] : memref<9x1x512xf32, #tpu.memory_space<vmem>>, vector<1x1x512xf32>
    %5 = vector.shape_cast %4 : vector<1x1x512xf32> to vector<1x512xf32>
    %c3 = arith.constant 3 : index
    %c0_6 = arith.constant 0 : index
    %c0_7 = arith.constant 0 : index
    %6 = vector.load %arg1[%c3, %c0_6, %c0_7] : memref<9x1x512xf32, #tpu.memory_space<vmem>>, vector<1x1x512xf32>
    %7 = vector.shape_cast %6 : vector<1x1x512xf32> to vector<1x512xf32>
    %c4 = arith.constant 4 : index
    %c0_8 = arith.constant 0 : index
    %c0_9 = arith.constant 0 : index
    %8 = vector.load %arg1[%c4, %c0_8, %c0_9] : memref<9x1x512xf32, #tpu.memory_space<vmem>>, vector<1x1x512xf32>
    %9 = vector.shape_cast %8 : vector<1x1x512xf32> to vector<1x512xf32>
    %c5 = arith.constant 5 : index
    %c0_10 = arith.constant 0 : index
    %c0_11 = arith.constant 0 : index
    %10 = vector.load %arg1[%c5, %c0_10, %c0_11] : memref<9x1x512xf32, #tpu.memory_space<vmem>>, vector<1x1x512xf32>
    %11 = vector.shape_cast %10 : vector<1x1x512xf32> to vector<1x512xf32>
    %c6 = arith.constant 6 : index
    %c0_12 = arith.constant 0 : index
    %c0_13 = arith.constant 0 : index
    %12 = vector.load %arg1[%c6, %c0_12, %c0_13] : memref<9x1x512xf32, #tpu.memory_space<vmem>>, vector<1x1x512xf32>
    %13 = vector.shape_cast %12 : vector<1x1x512xf32> to vector<1x512xf32>
    %c7 = arith.constant 7 : index
    %c0_14 = arith.constant 0 : index
    %c0_15 = arith.constant 0 : index
    %14 = vector.load %arg1[%c7, %c0_14, %c0_15] : memref<9x1x512xf32, #tpu.memory_space<vmem>>, vector<1x1x512xf32>
    %15 = vector.shape_cast %14 : vector<1x1x512xf32> to vector<1x512xf32>
    %c8 = arith.constant 8 : index
    %c0_16 = arith.constant 0 : index
    %c0_17 = arith.constant 0 : index
    %16 = vector.load %arg1[%c8, %c0_16, %c0_17] : memref<9x1x512xf32, #tpu.memory_space<vmem>>, vector<1x1x512xf32>
    %17 = vector.shape_cast %16 : vector<1x1x512xf32> to vector<1x512xf32>
    %c0_18 = arith.constant 0 : index
    %c0_19 = arith.constant 0 : index
    %18 = vector.load %arg0[%c0_18, %c0_19] : memref<8x512xf32, #tpu.memory_space<vmem>>, vector<8x512xf32>
    %c17_i32 = arith.constant 17 : i32
    %19 = tpu.dynamic_rotate %18 by %c17_i32 dim 1 : vector<8x512xf32>, i32 -> vector<8x512xf32>
    %20 = vector.broadcast %1 : vector<1x512xf32> to vector<8x512xf32>
    %21 = arith.mulf %19, %20 : vector<8x512xf32>
    %c0_20 = arith.constant 0 : index
    %c0_21 = arith.constant 0 : index
    %22 = vector.load %arg9[%c0_20, %c0_21] : memref<72x512xf32, #tpu.memory_space<vmem>>, vector<8x512xf32>
    tpu.vector_store %arg9[%c0_20, %c0_21], %21 {strides = array<i32>} : memref<72x512xf32, #tpu.memory_space<vmem>>, vector<8x512xf32>,
    %c16_i32 = arith.constant 16 : i32
    %23 = tpu.dynamic_rotate %18 by %c16_i32 dim 1 : vector<8x512xf32>, i32 -> vector<8x512xf32>
    %24 = vector.broadcast %3 : vector<1x512xf32> to vector<8x512xf32>
    %25 = arith.mulf %23, %24 : vector<8x512xf32>
    %c8_22 = arith.constant 8 : index
    %c0_23 = arith.constant 0 : index
    %26 = vector.load %arg9[%c8_22, %c0_23] : memref<72x512xf32, #tpu.memory_space<vmem>>, vector<8x512xf32>
    tpu.vector_store %arg9[%c8_22, %c0_23], %25 {strides = array<i32>} : memref<72x512xf32, #tpu.memory_space<vmem>>, vector<8x512xf32>,
    %c15_i32 = arith.constant 15 : i32
    %27 = tpu.dynamic_rotate %18 by %c15_i32 dim 1 : vector<8x512xf32>, i32 -> vector<8x512xf32>
    %28 = vector.broadcast %5 : vector<1x512xf32> to vector<8x512xf32>
    %29 = arith.mulf %27, %28 : vector<8x512xf32>
    %c16 = arith.constant 16 : index
    %c0_24 = arith.constant 0 : index
    %30 = vector.load %arg9[%c16, %c0_24] : memref<72x512xf32, #tpu.memory_space<vmem>>, vector<8x512xf32>
    tpu.vector_store %arg9[%c16, %c0_24], %29 {strides = array<i32>} : memref<72x512xf32, #tpu.memory_space<vmem>>, vector<8x512xf32>,
    %c1_i32 = arith.constant 1 : i32
    %31 = tpu.dynamic_rotate %18 by %c1_i32 dim 1 : vector<8x512xf32>, i32 -> vector<8x512xf32>
    %32 = vector.broadcast %7 : vector<1x512xf32> to vector<8x512xf32>
    %33 = arith.mulf %31, %32 : vector<8x512xf32>
    %c24 = arith.constant 24 : index
    %c0_25 = arith.constant 0 : index
    %34 = vector.load %arg9[%c24, %c0_25] : memref<72x512xf32, #tpu.memory_space<vmem>>, vector<8x512xf32>
    tpu.vector_store %arg9[%c24, %c0_25], %33 {strides = array<i32>} : memref<72x512xf32, #tpu.memory_space<vmem>>, vector<8x512xf32>,
    %35 = vector.broadcast %9 : vector<1x512xf32> to vector<8x512xf32>
    %36 = arith.mulf %18, %35 : vector<8x512xf32>
    %c32 = arith.constant 32 : index
    %c0_26 = arith.constant 0 : index
    %37 = vector.load %arg9[%c32, %c0_26] : memref<72x512xf32, #tpu.memory_space<vmem>>, vector<8x512xf32>
    tpu.vector_store %arg9[%c32, %c0_26], %36 {strides = array<i32>} : memref<72x512xf32, #tpu.memory_space<vmem>>, vector<8x512xf32>,
    %c511_i32 = arith.constant 511 : i32
    %38 = tpu.dynamic_rotate %18 by %c511_i32 dim 1 : vector<8x512xf32>, i32 -> vector<8x512xf32>
    %39 = vector.broadcast %11 : vector<1x512xf32> to vector<8x512xf32>
    %40 = arith.mulf %38, %39 : vector<8x512xf32>
    %c40 = arith.constant 40 : index
    %c0_27 = arith.constant 0 : index
    %41 = vector.load %arg9[%c40, %c0_27] : memref<72x512xf32, #tpu.memory_space<vmem>>, vector<8x512xf32>
    tpu.vector_store %arg9[%c40, %c0_27], %40 {strides = array<i32>} : memref<72x512xf32, #tpu.memory_space<vmem>>, vector<8x512xf32>,
    %c497_i32 = arith.constant 497 : i32
    %42 = tpu.dynamic_rotate %18 by %c497_i32 dim 1 : vector<8x512xf32>, i32 -> vector<8x512xf32>
    %43 = vector.broadcast %13 : vector<1x512xf32> to vector<8x512xf32>
    %44 = arith.mulf %42, %43 : vector<8x512xf32>
    %c48 = arith.constant 48 : index
    %c0_28 = arith.constant 0 : index
    %45 = vector.load %arg9[%c48, %c0_28] : memref<72x512xf32, #tpu.memory_space<vmem>>, vector<8x512xf32>
    tpu.vector_store %arg9[%c48, %c0_28], %44 {strides = array<i32>} : memref<72x512xf32, #tpu.memory_space<vmem>>, vector<8x512xf32>,
    %c496_i32 = arith.constant 496 : i32
    %46 = tpu.dynamic_rotate %18 by %c496_i32 dim 1 : vector<8x512xf32>, i32 -> vector<8x512xf32>
    %47 = vector.broadcast %15 : vector<1x512xf32> to vector<8x512xf32>
    %48 = arith.mulf %46, %47 : vector<8x512xf32>
    %c56 = arith.constant 56 : index
    %c0_29 = arith.constant 0 : index
    %49 = vector.load %arg9[%c56, %c0_29] : memref<72x512xf32, #tpu.memory_space<vmem>>, vector<8x512xf32>
    tpu.vector_store %arg9[%c56, %c0_29], %48 {strides = array<i32>} : memref<72x512xf32, #tpu.memory_space<vmem>>, vector<8x512xf32>,
    %c495_i32 = arith.constant 495 : i32
    %50 = tpu.dynamic_rotate %18 by %c495_i32 dim 1 : vector<8x512xf32>, i32 -> vector<8x512xf32>
    %51 = vector.broadcast %17 : vector<1x512xf32> to vector<8x512xf32>
    %52 = arith.mulf %50, %51 : vector<8x512xf32>
    %c64 = arith.constant 64 : index
    %c0_30 = arith.constant 0 : index
    %53 = vector.load %arg9[%c64, %c0_30] : memref<72x512xf32, #tpu.memory_space<vmem>>, vector<8x512xf32>
    tpu.vector_store %arg9[%c64, %c0_30], %52 {strides = array<i32>} : memref<72x512xf32, #tpu.memory_space<vmem>>, vector<8x512xf32>,
    %c0_31 = arith.constant 0 : index
    %c0_32 = arith.constant 0 : index
    %54 = vector.load %arg9[%c0_31, %c0_32] : memref<72x512xf32, #tpu.memory_space<vmem>>, vector<72x512xf32>
    %55 = arith.truncf %54 : vector<72x512xf32> to vector<72x512xbf16>
    %c0_33 = arith.constant 0 : index
    %c0_34 = arith.constant 0 : index
    %56 = vector.load %arg2[%c0_33, %c0_34] : memref<8x72xbf16, #tpu.memory_space<vmem>>, vector<8x72xbf16>
    %cst = arith.constant dense<0.000000e+00> : vector<8x512xf32>
    %57 = tpu.matmul %56, %55, %cst {dimension_numbers = #tpu.dot_dimension_numbers<[1], [0], [0], [1], [0, 0, 1, 1], [], []>} : vector<8x72xbf16>, vector<72x512xbf16>, vector<8x512xf32> -> vector<8x512xf32>
    %cst_35 = arith.constant dense<0.000000e+00> : vector<8xf32>
    %58 = vector.multi_reduction <add>, %57, %cst_35 [1] : vector<8x512xf32> to vector<8xf32>
    %59 = vector.shape_cast %58 : vector<8xf32> to vector<8x1xf32>
    %cst_36 = arith.constant 0.001953125 : f32
    %60 = vector.broadcast %cst_36 : f32 to vector<8x1xf32>
    %61 = arith.mulf %59, %60 : vector<8x1xf32>
    %62 = arith.mulf %57, %57 : vector<8x512xf32>
    %cst_37 = arith.constant dense<0.000000e+00> : vector<8xf32>
    %63 = vector.multi_reduction <add>, %62, %cst_37 [1] : vector<8x512xf32> to vector<8xf32>
    %64 = vector.shape_cast %63 : vector<8xf32> to vector<8x1xf32>
    %cst_38 = arith.constant 0.001953125 : f32
    %65 = vector.broadcast %cst_38 : f32 to vector<8x1xf32>
    %66 = arith.mulf %64, %65 : vector<8x1xf32>
    %67 = arith.mulf %61, %61 : vector<8x1xf32>
    %68 = arith.subf %66, %67 : vector<8x1xf32>
    %c0_39 = arith.constant 0 : index
    %c0_40 = arith.constant 0 : index
    %69 = vector.load %arg3[%c0_39, %c0_40] : memref<8x1xf32, #tpu.memory_space<vmem>>, vector<8x1xf32>
    %cst_41 = arith.constant 9.99999974E-6 : f32
    %70 = vector.broadcast %cst_41 : f32 to vector<8x1xf32>
    %71 = arith.addf %68, %70 : vector<8x1xf32>
    %72 = math.rsqrt %71 : vector<8x1xf32>
    %73 = arith.mulf %69, %72 : vector<8x1xf32>
    %c0_42 = arith.constant 0 : index
    %c0_43 = arith.constant 0 : index
    %74 = vector.load %arg4[%c0_42, %c0_43] : memref<8x1xf32, #tpu.memory_space<vmem>>, vector<8x1xf32>
    %75 = arith.mulf %61, %73 : vector<8x1xf32>
    %76 = arith.subf %74, %75 : vector<8x1xf32>
    %77 = vector.broadcast %73 : vector<8x1xf32> to vector<8x512xf32>
    %78 = arith.mulf %57, %77 : vector<8x512xf32>
    %79 = vector.broadcast %76 : vector<8x1xf32> to vector<8x512xf32>
    %80 = arith.addf %78, %79 : vector<8x512xf32>
    %cst_44 = arith.constant 0.000000e+00 : f32
    %81 = vector.broadcast %cst_44 : f32 to vector<8x512xf32>
    %82 = arith.maximumf %80, %81 : vector<8x512xf32>
    %c17_i32_45 = arith.constant 17 : i32
    %83 = tpu.dynamic_rotate %82 by %c17_i32_45 dim 1 : vector<8x512xf32>, i32 -> vector<8x512xf32>
    %84 = vector.broadcast %1 : vector<1x512xf32> to vector<8x512xf32>
    %85 = arith.mulf %83, %84 : vector<8x512xf32>
    %c0_46 = arith.constant 0 : index
    %c0_47 = arith.constant 0 : index
    %86 = vector.load %arg10[%c0_46, %c0_47] : memref<72x512xf32, #tpu.memory_space<vmem>>, vector<8x512xf32>
    tpu.vector_store %arg10[%c0_46, %c0_47], %85 {strides = array<i32>} : memref<72x512xf32, #tpu.memory_space<vmem>>, vector<8x512xf32>,
    %c16_i32_48 = arith.constant 16 : i32
    %87 = tpu.dynamic_rotate %82 by %c16_i32_48 dim 1 : vector<8x512xf32>, i32 -> vector<8x512xf32>
    %88 = vector.broadcast %3 : vector<1x512xf32> to vector<8x512xf32>
    %89 = arith.mulf %87, %88 : vector<8x512xf32>
    %c8_49 = arith.constant 8 : index
    %c0_50 = arith.constant 0 : index
    %90 = vector.load %arg10[%c8_49, %c0_50] : memref<72x512xf32, #tpu.memory_space<vmem>>, vector<8x512xf32>
    tpu.vector_store %arg10[%c8_49, %c0_50], %89 {strides = array<i32>} : memref<72x512xf32, #tpu.memory_space<vmem>>, vector<8x512xf32>,
    %c15_i32_51 = arith.constant 15 : i32
    %91 = tpu.dynamic_rotate %82 by %c15_i32_51 dim 1 : vector<8x512xf32>, i32 -> vector<8x512xf32>
    %92 = vector.broadcast %5 : vector<1x512xf32> to vector<8x512xf32>
    %93 = arith.mulf %91, %92 : vector<8x512xf32>
    %c16_52 = arith.constant 16 : index
    %c0_53 = arith.constant 0 : index
    %94 = vector.load %arg10[%c16_52, %c0_53] : memref<72x512xf32, #tpu.memory_space<vmem>>, vector<8x512xf32>
    tpu.vector_store %arg10[%c16_52, %c0_53], %93 {strides = array<i32>} : memref<72x512xf32, #tpu.memory_space<vmem>>, vector<8x512xf32>,
    %c1_i32_54 = arith.constant 1 : i32
    %95 = tpu.dynamic_rotate %82 by %c1_i32_54 dim 1 : vector<8x512xf32>, i32 -> vector<8x512xf32>
    %96 = vector.broadcast %7 : vector<1x512xf32> to vector<8x512xf32>
    %97 = arith.mulf %95, %96 : vector<8x512xf32>
    %c24_55 = arith.constant 24 : index
    %c0_56 = arith.constant 0 : index
    %98 = vector.load %arg10[%c24_55, %c0_56] : memref<72x512xf32, #tpu.memory_space<vmem>>, vector<8x512xf32>
    tpu.vector_store %arg10[%c24_55, %c0_56], %97 {strides = array<i32>} : memref<72x512xf32, #tpu.memory_space<vmem>>, vector<8x512xf32>,
    %99 = vector.broadcast %9 : vector<1x512xf32> to vector<8x512xf32>
    %100 = arith.mulf %82, %99 : vector<8x512xf32>
    %c32_57 = arith.constant 32 : index
    %c0_58 = arith.constant 0 : index
    %101 = vector.load %arg10[%c32_57, %c0_58] : memref<72x512xf32, #tpu.memory_space<vmem>>, vector<8x512xf32>
    tpu.vector_store %arg10[%c32_57, %c0_58], %100 {strides = array<i32>} : memref<72x512xf32, #tpu.memory_space<vmem>>, vector<8x512xf32>,
    %c511_i32_59 = arith.constant 511 : i32
    %102 = tpu.dynamic_rotate %82 by %c511_i32_59 dim 1 : vector<8x512xf32>, i32 -> vector<8x512xf32>
    %103 = vector.broadcast %11 : vector<1x512xf32> to vector<8x512xf32>
    %104 = arith.mulf %102, %103 : vector<8x512xf32>
    %c40_60 = arith.constant 40 : index
    %c0_61 = arith.constant 0 : index
    %105 = vector.load %arg10[%c40_60, %c0_61] : memref<72x512xf32, #tpu.memory_space<vmem>>, vector<8x512xf32>
    tpu.vector_store %arg10[%c40_60, %c0_61], %104 {strides = array<i32>} : memref<72x512xf32, #tpu.memory_space<vmem>>, vector<8x512xf32>,
    %c497_i32_62 = arith.constant 497 : i32
    %106 = tpu.dynamic_rotate %82 by %c497_i32_62 dim 1 : vector<8x512xf32>, i32 -> vector<8x512xf32>
    %107 = vector.broadcast %13 : vector<1x512xf32> to vector<8x512xf32>
    %108 = arith.mulf %106, %107 : vector<8x512xf32>
    %c48_63 = arith.constant 48 : index
    %c0_64 = arith.constant 0 : index
    %109 = vector.load %arg10[%c48_63, %c0_64] : memref<72x512xf32, #tpu.memory_space<vmem>>, vector<8x512xf32>
    tpu.vector_store %arg10[%c48_63, %c0_64], %108 {strides = array<i32>} : memref<72x512xf32, #tpu.memory_space<vmem>>, vector<8x512xf32>,
    %c496_i32_65 = arith.constant 496 : i32
    %110 = tpu.dynamic_rotate %82 by %c496_i32_65 dim 1 : vector<8x512xf32>, i32 -> vector<8x512xf32>
    %111 = vector.broadcast %15 : vector<1x512xf32> to vector<8x512xf32>
    %112 = arith.mulf %110, %111 : vector<8x512xf32>
    %c56_66 = arith.constant 56 : index
    %c0_67 = arith.constant 0 : index
    %113 = vector.load %arg10[%c56_66, %c0_67] : memref<72x512xf32, #tpu.memory_space<vmem>>, vector<8x512xf32>
    tpu.vector_store %arg10[%c56_66, %c0_67], %112 {strides = array<i32>} : memref<72x512xf32, #tpu.memory_space<vmem>>, vector<8x512xf32>,
    %c495_i32_68 = arith.constant 495 : i32
    %114 = tpu.dynamic_rotate %82 by %c495_i32_68 dim 1 : vector<8x512xf32>, i32 -> vector<8x512xf32>
    %115 = vector.broadcast %17 : vector<1x512xf32> to vector<8x512xf32>
    %116 = arith.mulf %114, %115 : vector<8x512xf32>
    %c64_69 = arith.constant 64 : index
    %c0_70 = arith.constant 0 : index
    %117 = vector.load %arg10[%c64_69, %c0_70] : memref<72x512xf32, #tpu.memory_space<vmem>>, vector<8x512xf32>
    tpu.vector_store %arg10[%c64_69, %c0_70], %116 {strides = array<i32>} : memref<72x512xf32, #tpu.memory_space<vmem>>, vector<8x512xf32>,
    %c0_71 = arith.constant 0 : index
    %c0_72 = arith.constant 0 : index
    %118 = vector.load %arg10[%c0_71, %c0_72] : memref<72x512xf32, #tpu.memory_space<vmem>>, vector<72x512xf32>
    %119 = arith.truncf %118 : vector<72x512xf32> to vector<72x512xbf16>
    %c0_73 = arith.constant 0 : index
    %c0_74 = arith.constant 0 : index
    %120 = vector.load %arg5[%c0_73, %c0_74] : memref<8x72xbf16, #tpu.memory_space<vmem>>, vector<8x72xbf16>
    %cst_75 = arith.constant dense<0.000000e+00> : vector<8x512xf32>
    %121 = tpu.matmul %120, %119, %cst_75 {dimension_numbers = #tpu.dot_dimension_numbers<[1], [0], [0], [1], [0, 0, 1, 1], [], []>} : vector<8x72xbf16>, vector<72x512xbf16>, vector<8x512xf32> -> vector<8x512xf32>
    %cst_76 = arith.constant dense<0.000000e+00> : vector<8xf32>
    %122 = vector.multi_reduction <add>, %121, %cst_76 [1] : vector<8x512xf32> to vector<8xf32>
    %123 = vector.shape_cast %122 : vector<8xf32> to vector<8x1xf32>
    %cst_77 = arith.constant 0.001953125 : f32
    %124 = vector.broadcast %cst_77 : f32 to vector<8x1xf32>
    %125 = arith.mulf %123, %124 : vector<8x1xf32>
    %126 = arith.mulf %121, %121 : vector<8x512xf32>
    %cst_78 = arith.constant dense<0.000000e+00> : vector<8xf32>
    %127 = vector.multi_reduction <add>, %126, %cst_78 [1] : vector<8x512xf32> to vector<8xf32>
    %128 = vector.shape_cast %127 : vector<8xf32> to vector<8x1xf32>
    %cst_79 = arith.constant 0.001953125 : f32
    %129 = vector.broadcast %cst_79 : f32 to vector<8x1xf32>
    %130 = arith.mulf %128, %129 : vector<8x1xf32>
    %131 = arith.mulf %125, %125 : vector<8x1xf32>
    %132 = arith.subf %130, %131 : vector<8x1xf32>
    %c0_80 = arith.constant 0 : index
    %c0_81 = arith.constant 0 : index
    %133 = vector.load %arg6[%c0_80, %c0_81] : memref<8x1xf32, #tpu.memory_space<vmem>>, vector<8x1xf32>
    %cst_82 = arith.constant 9.99999974E-6 : f32
    %134 = vector.broadcast %cst_82 : f32 to vector<8x1xf32>
    %135 = arith.addf %132, %134 : vector<8x1xf32>
    %136 = math.rsqrt %135 : vector<8x1xf32>
    %137 = arith.mulf %133, %136 : vector<8x1xf32>
    %c0_83 = arith.constant 0 : index
    %c0_84 = arith.constant 0 : index
    %138 = vector.load %arg7[%c0_83, %c0_84] : memref<8x1xf32, #tpu.memory_space<vmem>>, vector<8x1xf32>
    %139 = arith.mulf %125, %137 : vector<8x1xf32>
    %140 = arith.subf %138, %139 : vector<8x1xf32>
    %141 = vector.broadcast %137 : vector<8x1xf32> to vector<8x512xf32>
    %142 = arith.mulf %121, %141 : vector<8x512xf32>
    %143 = vector.broadcast %140 : vector<8x1xf32> to vector<8x512xf32>
    %144 = arith.addf %142, %143 : vector<8x512xf32>
    %cst_85 = arith.constant 0.000000e+00 : f32
    %145 = vector.broadcast %cst_85 : f32 to vector<8x512xf32>
    %146 = arith.maximumf %144, %145 : vector<8x512xf32>
    %147 = vector.extract_strided_slice %146 {offsets = [0, 0], sizes = [8, 256], strides = [1, 1]} : vector<8x512xf32> to vector<8x256xf32>
    %c0_86 = arith.constant 0 : index
    %c0_87 = arith.constant 0 : index
    %c0_88 = arith.constant 0 : index
    %148 = vector.load %arg8[%c0_86, %c0_87, %c0_88] : memref<2x8x256xf32, #tpu.memory_space<vmem>>, vector<1x8x256xf32>
    %149 = vector.shape_cast %148 : vector<1x8x256xf32> to vector<8x256xf32>
    %150 = vector.shape_cast %147 : vector<8x256xf32> to vector<1x8x256xf32>
    tpu.vector_store %arg8[%c0_86, %c0_87, %c0_88], %150 {strides = array<i32>} : memref<2x8x256xf32, #tpu.memory_space<vmem>>, vector<1x8x256xf32>,
    %151 = vector.extract_strided_slice %146 {offsets = [0, 256], sizes = [8, 256], strides = [1, 1]} : vector<8x512xf32> to vector<8x256xf32>
    %c1_89 = arith.constant 1 : index
    %c0_90 = arith.constant 0 : index
    %c0_91 = arith.constant 0 : index
    %152 = vector.load %arg8[%c1_89, %c0_90, %c0_91] : memref<2x8x256xf32, #tpu.memory_space<vmem>>, vector<1x8x256xf32>
    %153 = vector.shape_cast %152 : vector<1x8x256xf32> to vector<8x256xf32>
    %154 = vector.shape_cast %151 : vector<8x256xf32> to vector<1x8x256xf32>
    tpu.vector_store %arg8[%c1_89, %c0_90, %c0_91], %154 {strides = array<i32>} : memref<2x8x256xf32, #tpu.memory_space<vmem>>, vector<1x8x256xf32>,
    return
  }
}

</mosaic_0001>

<bundles_post_ra>
// kernel: inconv_forward.1
= control target key start
LH: loop header
LB: loop body
LE: loop exit
PB: predicated region body
PF: predicated region fallthrough
CT: control target
= control target key end

     0   :  { %s882_s9 = smov 113   ;;  %s883_s10 = smov 111   ;;  %v59_v6 = vlaneseq  ;;  %vm371_vm1 = vcmask 1043456   ;;  %vm367_vm9 = vcmask 588800   ;;  %s1541_s0 = inlined_call_operand.vmem [shape: f32[8,512], index: 0, kind: input, shape index: {}]   ;;  %s1542_s1 = inlined_call_operand.vmem [shape: f32[9,1,512], index: 1, kind: input, shape index: {}]   ;;  %s1543_s2 = inlined_call_operand.vmem [shape: bf16[8,72], index: 2, kind: input, shape index: {}]   ;;  %s1544_s3 = inlined_call_operand.vmem [shape: f32[8,1], index: 3, kind: input, shape index: {}]   ;;  %s1545_s4 = inlined_call_operand.vmem [shape: f32[8,1], index: 4, kind: input, shape index: {}]   ;;  %s1546_s5 = inlined_call_operand.vmem [shape: bf16[8,72], index: 5, kind: input, shape index: {}]   ;;  %s1547_s6 = inlined_call_operand.vmem [shape: f32[8,1], index: 6, kind: input, shape index: {}]   ;;  %s1548_s7 = inlined_call_operand.vmem [shape: f32[8,1], index: 7, kind: input, shape index: {}]   ;;  %s1549_s8 = inlined_call_operand.vmem [shape: f32[2,8,256], index: 8, kind: output, shape index: {}]  }
   0x1   :  { %v939_v0 = vld [vmem:[%s1541_s0 + $0x10] sm:$0xff]  ;;  %v944_v1 = vld [vmem:[%s1541_s0] sm:$0xff]  ;;  %v955_v2 = vld [vmem:[%s1541_s0 + $0x18] sm:$0xff]  ;;  %s884_s15 = smov 112   ;;  %s886_s16 = smov 15  }
   0x2   :  { %224 = vrot.lane.b32.xlu2 %v939_v0, %s882_s9  ;;  %284 = vrot.lane.b32.xlu0 %v939_v0, %s883_s10  ;;  %v960_v3 = vld [vmem:[%s1541_s0 + $0x8] sm:$0xff]  ;;  %s885_s0 = smov 127   ;;  %s887_s17 = smov 1   ;;  %v1027_v10 = vld [vmem:[%s1542_s1 + $0x20] sm:$0xf]  ;;  %v1029_v11 = vand.u32 127, %v59_v6 }
   0x3   :  { %280 = vrot.lane.b32.xlu1 %v944_v1, %s883_s10  ;;  %s888_s18 = smov 17   ;;  %s889_s19 = smov 16   ;;  %v296_v12 = vperm.slane %v1027_v10, 2  ;;  %v294_v13 = vperm.slane %v1027_v10, 0  ;;  %v295_v14 = vperm.slane %v1027_v10, 1  ;;  %v297_v15 = vperm.slane %v1027_v10, 3 }
   0x4   :  { %vm288_vm0 = vcmp.lt.s32.totalorder %v1029_v11, 111  ;;  %v1049_v23 = vld [vmem:[%s1542_s1 + $0x18] sm:$0xf]  ;;  %v1060_v29 = vld [vmem:[%s1542_s1 + $0x1c] sm:$0xf]  ;;  %vm228_vm2 = vcmp.lt.s32.totalorder %v1029_v11, 113 }
   0x5   :  { %v236_v33 = vperm.slane %v1049_v23, 2  ;;  %vm258_vm3 = vcmp.lt.s32.totalorder %v1029_v11, 112  ;;  %v266_v38 = vperm.slane %v1060_v29, 2  ;;  %v1078_v43 = vld [vmem:[%s1542_s1 + $0x10] sm:$0xf]  ;;  %v237_v47 = vperm.slane %v1049_v23, 3 }
   0x6   :  { %v1087_v46 = vld [vmem:[%s1542_s1 + $0x14] sm:$0xf]  ;;  %vm198_vm4 = vcmp.lt.s32.totalorder %v1029_v11, 127  ;;  %v176_v50 = vperm.slane %v1078_v43, 2  ;;  %v267_v53 = vperm.slane %v1060_v29, 3  ;;  %v177_v54 = vperm.slane %v1078_v43, 3 }
   0x7   :  { %v207_v52 = vperm.slane %v1087_v46, 3  ;;  %v206_v56 = vperm.slane %v1087_v46, 2  ;;  %vm121_vm5 = vcmp.lt.s32.totalorder %v1029_v11, 15  ;;  %vm151_vm6 = vcmp.lt.s32.totalorder %v1029_v11, 1 }
   0x8   :  { %v184_v61 = vmul.f32 %v176_v50, %v939_v0  ;;  %v185_v6 = vmul.f32 %v177_v54, %v955_v2  ;;  %vm61_vm7 = vcmp.lt.s32.totalorder %v1029_v11, 17  ;;  %vm91_vm8 = vcmp.lt.s32.totalorder %v1029_v11, 16 }
   0xa   :  { %226 = vrot.lane.b32.xlu2 %v955_v2, %s882_s9  ;;  %286 = vrot.lane.b32.xlu0 %v955_v2, %s883_s10 }
   0xb   :  { %282 = vrot.lane.b32.xlu1 %v960_v3, %s883_s10 }
  0x12   :  { %254 = vrot.lane.b32.xlu0 %v939_v0, %s884_s15  ;;  %220 = vrot.lane.b32.xlu2 %v944_v1, %s882_s9 }
  0x13   :  { %256 = vrot.lane.b32.xlu1 %v955_v2, %s884_s15 }
  0x1a   :  { %250 = vrot.lane.b32.xlu0 %v944_v1, %s884_s15  ;;  %196 = vrot.lane.b32.xlu2 %v955_v2, %s885_s0 }
  0x1b   :  { %194 = vrot.lane.b32.xlu1 %v939_v0, %s885_s0 }
  0x22   :  { %222 = vrot.lane.b32.xlu0 %v960_v3, %s882_s9  ;;  %190 = vrot.lane.b32.xlu2 %v944_v1, %s885_s0 }
  0x23   :  { %252 = vrot.lane.b32.xlu1 %v960_v3, %s884_s15 }
  0x2a   :  { %115 = vrot.lane.b32.xlu0 %v960_v3, %s886_s16  ;;  %145 = vrot.lane.b32.xlu2 %v960_v3, %s887_s17 }
  0x2b   :  { %117 = vrot.lane.b32.xlu1 %v939_v0, %s886_s16 }
  0x32   :  { %147 = vrot.lane.b32.xlu0 %v939_v0, %s887_s17  ;;  %119 = vrot.lane.b32.xlu2 %v955_v2, %s886_s16 }
  0x33   :  { %192 = vrot.lane.b32.xlu1 %v960_v3, %s885_s0 }
  0x3a   :  { %149 = vrot.lane.b32.xlu0 %v955_v2, %s887_s17  ;;  %55 = vrot.lane.b32.xlu2 %v939_v0, %s888_s18 }
  0x3b   :  { %53 = vrot.lane.b32.xlu1 %v960_v3, %s888_s18 }
  0x42   :  { %85 = vrot.lane.b32.xlu0 %v960_v3, %s889_s19  ;;  %113 = vrot.lane.b32.xlu2 %v944_v1, %s886_s16 }
  0x43   :  { %87 = vrot.lane.b32.xlu1 %v939_v0, %s889_s19  ;;  %v234_v0 = vperm.slane %v1049_v23, 0 }
  0x4a   :  { %143 = vrot.lane.b32.xlu0 %v944_v1, %s887_s17  ;;  %89 = vrot.lane.b32.xlu2 %v955_v2, %s889_s19 }
  0x4b   :  { %57 = vrot.lane.b32.xlu1 %v955_v2, %s888_s18 }
  0x52   :  { %51 = vrot.lane.b32.xlu0 %v944_v1, %s888_s18 }
  0x53   :  { %83 = vrot.lane.b32.xlu1 %v944_v1, %s889_s19 }
  0x5c   :  { %v1020_v4 = vpop.permute.xlu2 %224 }
  0x64   :  { %v227_v5 = vpop.permute.xlu2 %226 }
  0x65   :  { %v229_v39 = vsel %vm228_vm2, %v1020_v4, %v227_v5 }
  0x66   :  { %v244_v44 = vmul.f32 %v236_v33, %v229_v39  ;;  %v1156_v39 = vld [vmem:[%s1542_s1 + $0xc] sm:$0xf] }
  0x6c   :  { %v1022_v8 = vpop.permute.xlu2 %220 }
  0x6d   :  { %v232_v51 = vsel %vm228_vm2, %v227_v5, %v1022_v8 }
  0x6e   :  { %v245_v58 = vmul.f32 %v237_v47, %v232_v51  ;;  %v205_v51 = vperm.slane %v1087_v46, 1 }
  0x74   :  { %v285_v7 = vpop.permute.xlu0 %284  ;;  %v197_v24 = vpop.permute.xlu2 %196 }
  0x75   :  { %v281_v9 = vpop.permute.xlu1 %280 }
  0x7c   :  { %v287_v16 = vpop.permute.xlu0 %286  ;;  %v1091_v48 = vpop.permute.xlu2 %190 }
  0x7d   :  { %v289_v17 = vsel %vm288_vm0, %v285_v7, %v287_v16  ;;  %v292_v18 = vsel %vm288_vm0, %v287_v16, %v281_v9  ;;  %v283_v19 = vpop.permute.xlu1 %282  ;;  %v202_v55 = vsel %vm198_vm4, %v197_v24, %v1091_v48 }
  0x7e   :  { %v290_v20 = vsel %vm288_vm0, %v283_v19, %v285_v7  ;;  %v291_v21 = vsel %vm288_vm0, %v281_v9, %v283_v19  ;;  %v304_v22 = vmul.f32 %v296_v12, %v289_v17  ;;  %v305_v27 = vmul.f32 %v297_v15, %v292_v18 }
  0x7f   :  { %v302_v25 = vmul.f32 %v294_v13, %v291_v21  ;;  %v303_v26 = vmul.f32 %v295_v14, %v290_v20  ;;  %v215_v62 = vmul.f32 %v207_v52, %v202_v55  ;;  %v235_v17 = vperm.slane %v1049_v23, 1 }
  0x80   :  { %v364_v28 = vpack.c.bf16 %v304_v22, %v304_v22  ;;  %v365_v32 = vpack.c.bf16 %v305_v27, %v305_v27  ;;  %v264_v20 = vperm.slane %v1060_v29, 0  ;;  %v265_v21 = vperm.slane %v1060_v29, 1 }
  0x81   :  { %v362_v30 = vpack.c.bf16 %v302_v25, %v302_v25  ;;  %v363_v31 = vpack.c.bf16 %v303_v26, %v303_v26  ;;  %v357_v18 = vpack.c.bf16 %v215_v62, %v185_v6 }
  0x82   :  { %v379_v34 = vsel %vm371_vm1, %v364_v28, 0  ;;  %v382_v37 = vsel %vm371_vm1, %v365_v32, 0 }
  0x83   :  { %v373_v35 = vsel %vm371_vm1, %v362_v30, 0  ;;  %v376_v36 = vsel %vm371_vm1, %v363_v31, 0  ;;  %413 = vmatpush.bf16.msra.mxu2 %v379_v34  ;;  %426 = vmatpush.bf16.msra.mxu3 %v382_v37  ;;  %v1151_v37 = vld [vmem:[%s1542_s1 + $0x8] sm:$0xf] }
  0x84   :  { %387 = vmatpush.bf16.msra.mxu0 %v373_v35  ;;  %400 = vmatpush.bf16.msra.mxu1 %v376_v36  ;;  %v255_v40 = vpop.permute.xlu0 %254  ;;  %v1124_v19 = vpop.permute.xlu2 %145 }
  0x85   :  { %v257_v41 = vpop.permute.xlu1 %256 }
  0x86   :  { %v259_v42 = vsel %vm258_vm3, %v255_v40, %v257_v41 }
  0x87   :  { %v274_v45 = vmul.f32 %v266_v38, %v259_v42  ;;  %v129_v42 = vperm.slane %v1151_v37, 2 }
  0x89   :  { %v360_v49 = vpack.c.bf16 %v274_v45, %v244_v44  ;;  %v159_v44 = vperm.slane %v1156_v39, 2 }
  0x8b   :  { %414 = vmatpush.bf16.msra.mxu2 %v360_v49  ;;  %v204_v49 = vperm.slane %v1087_v46, 0 }
  0x8c   :  { %v251_v57 = vpop.permute.xlu0 %250  ;;  %v120_v35 = vpop.permute.xlu2 %119 }
  0x8d   :  { %v262_v59 = vsel %vm258_vm3, %v257_v41, %v251_v57  ;;  %v195_v60 = vpop.permute.xlu1 %194  ;;  %v175_v41 = vperm.slane %v1078_v43, 1 }
  0x8e   :  { %v275_v63 = vmul.f32 %v267_v53, %v262_v59  ;;  %v199_v5 = vsel %vm198_vm4, %v195_v60, %v197_v24 }
  0x8f   :  { %v214_v7 = vmul.f32 %v206_v56, %v199_v5 }
  0x90   :  { %v361_v9 = vpack.c.bf16 %v275_v63, %v245_v58 }
  0x91   :  { %v356_v16 = vpack.c.bf16 %v214_v7, %v184_v61  ;;  %v183_v61 = vmul.f32 %v175_v41, %v960_v3 }
  0x92   :  { %427 = vmatpush.bf16.msra.mxu3 %v361_v9 }
  0x93   :  { %415 = vmatpush.bf16.msra.mxu2 %v356_v16 }
  0x94   :  { %v223_v22 = vpop.permute.xlu0 %222  ;;  %v56_v7 = vpop.permute.xlu2 %55 }
  0x95   :  { %v230_v2 = vsel %vm228_vm2, %v223_v22, %v1020_v4  ;;  %v231_v24 = vsel %vm228_vm2, %v1022_v8, %v223_v22  ;;  %v253_v25 = vpop.permute.xlu1 %252  ;;  %v130_v22 = vperm.slane %v1151_v37, 3 }
  0x96   :  { %v242_v26 = vmul.f32 %v234_v0, %v231_v24  ;;  %v243_v27 = vmul.f32 %v235_v17, %v230_v2  ;;  %v260_v28 = vsel %vm258_vm3, %v253_v25, %v255_v40  ;;  %v261_v30 = vsel %vm258_vm3, %v251_v57, %v253_v25  ;;  %428 = vmatpush.bf16.msra.mxu3 %v357_v18 }
  0x97   :  { %v272_v4 = vmul.f32 %v264_v20, %v261_v30  ;;  %v273_v8 = vmul.f32 %v265_v21, %v260_v28  ;;  %v174_v40 = vperm.slane %v1078_v43, 0  ;;  %v160_v2 = vperm.slane %v1156_v39, 3  ;;  %v1204_v28 = vld [vmem:[%s1542_s1] sm:$0xf] }
  0x99   :  { %v358_v31 = vpack.c.bf16 %v272_v4, %v242_v26  ;;  %v359_v32 = vpack.c.bf16 %v273_v8, %v243_v27  ;;  %v182_v59 = vmul.f32 %v174_v40, %v944_v1  ;;  %v1209_v4 = vld [vmem:[%s1542_s1 + $0x4] sm:$0xf] }
  0x9b   :  { %388 = vmatpush.bf16.msra.mxu0 %v358_v31  ;;  %401 = vmatpush.bf16.msra.mxu1 %v359_v32  ;;  %v69_v31 = vperm.slane %v1204_v28, 2  ;;  %v99_v32 = vperm.slane %v1209_v4, 2 }
  0x9c   :  { %v1146_v34 = vpop.permute.xlu0 %115  ;;  %v114_v8 = vpop.permute.xlu2 %113 }
  0x9d   :  { %v118_v36 = vpop.permute.xlu1 %117 }
  0x9e   :  { %v123_v45 = vsel %vm121_vm5, %v1146_v34, %v118_v36 }
  0x9f   :  { %v137_v62 = vmul.f32 %v129_v42, %v123_v45 }
  0xa4   :  { %v148_v55 = vpop.permute.xlu0 %147 }
  0xa5   :  { %v153_v57 = vsel %vm151_vm6, %v1124_v19, %v148_v55  ;;  %v193_v58 = vpop.permute.xlu1 %192 }
  0xa6   :  { %v167_v63 = vmul.f32 %v159_v44, %v153_v57  ;;  %v200_v5 = vsel %vm198_vm4, %v193_v58, %v195_v60  ;;  %v201_v6 = vsel %vm198_vm4, %v1091_v48, %v193_v58  ;;  %v122_v60 = vsel %vm121_vm5, %v118_v36, %v120_v35 }
  0xa7   :  { %v212_v1 = vmul.f32 %v204_v49, %v201_v6  ;;  %v213_v3 = vmul.f32 %v205_v51, %v200_v5  ;;  %v138_v26 = vmul.f32 %v130_v22, %v122_v60  ;;  %v128_v5 = vperm.slane %v1151_v37, 1  ;;  %v366_v60 = vld [vmem:[%s1543_s2] sm:$0xf] }
  0xa8   :  { %v352_v9 = vpack.c.bf16 %v167_v63, %v137_v62  ;;  %v90_v62 = vpop.permute.xlu2 %89  ;;  %v125_v6 = vsel %vm121_vm5, %v120_v35, %v114_v8 }
  0xa9   :  { %v354_v16 = vpack.c.bf16 %v212_v1, %v182_v59  ;;  %v355_v18 = vpack.c.bf16 %v213_v3, %v183_v61  ;;  %v127_v61 = vperm.slane %v1151_v37, 0  ;;  %v157_v1 = vperm.slane %v1156_v39, 0 }
  0xaa   :  { %416 = vmatpush.bf16.msra.mxu2 %v352_v9  ;;  %v158_v3 = vperm.slane %v1156_v39, 1  ;;  %v124_v9 = vsel %vm121_vm5, %v114_v8, %v1146_v34 }
  0xab   :  { %389 = vmatpush.bf16.msra.mxu0 %v354_v16  ;;  %402 = vmatpush.bf16.msra.mxu1 %v355_v18  ;;  %v1555_v16 = vperm.slane %v1209_v4, 3  ;;  %v1554_v18 = vperm.slane %v1204_v28, 3  ;;  %v136_v8 = vmul.f32 %v128_v5, %v124_v9  ;;  %v1553_v9 = vperm.slane %v1204_v28, 1 }
  0xac   :  { %v150_v48 = vpop.permute.xlu0 %149 }
  0xad   :  { %v152_v24 = vsel %vm151_vm6, %v148_v55, %v150_v48  ;;  %v54_v25 = vpop.permute.xlu1 %53 }
  0xae   :  { %v168_v27 = vmul.f32 %v160_v2, %v152_v24  ;;  %v63_v36 = vsel %vm61_vm7, %v54_v25, %v56_v7 }
  0xaf   :  { %v77_v58 = vmul.f32 %v69_v31, %v63_v36 }
  0xb0   :  { %v353_v30 = vpack.c.bf16 %v168_v27, %v138_v26  ;;  %v135_v26 = vmul.f32 %v127_v61, %v125_v6  ;;  %v1552_v6 = vperm.slane %v1204_v28, 0 }
  0xb2   :  { %429 = vmatpush.bf16.msra.mxu3 %v353_v30 }
  0xb4   :  { %v86_v45 = vpop.permute.xlu0 %85 }
  0xb5   :  { %v88_v55 = vpop.permute.xlu1 %87 }
  0xb6   :  { %v93_v57 = vsel %vm91_vm8, %v86_v45, %v88_v55  ;;  %v92_v35 = vsel %vm91_vm8, %v88_v55, %v90_v62 }
  0xb7   :  { %v107_v59 = vmul.f32 %v99_v32, %v93_v57 }
  0xb9   :  { %v348_v63 = vpack.c.bf16 %v107_v59, %v77_v58 }
  0xbb   :  { %417 = vmatpush.bf16.msra.mxu2 %v348_v63 }
  0xbc   :  { %v144_v24 = vpop.permute.xlu0 %143 }
  0xbd   :  { %v154_v34 = vsel %vm151_vm6, %v144_v24, %v1124_v19  ;;  %v155_v27 = vsel %vm151_vm6, %v150_v48, %v144_v24  ;;  %v58_v30 = vpop.permute.xlu1 %57  ;;  %v108_v19 = vmul.f32 %v1555_v16, %v92_v35  ;;  %v1551_v24 = vperm.slane %v1209_v4, 1 }
  0xbe   :  { %v165_v36 = vmul.f32 %v157_v1, %v155_v27  ;;  %v166_v55 = vmul.f32 %v158_v3, %v154_v34  ;;  %v62_v57 = vsel %vm61_vm7, %v56_v7, %v58_v30  ;;  %859 = vmatmul.msk.bf16.vlgmr.msra.gmra.mxu2 %vm367_vm9, %v366_v60  ;;  %v1550_v7 = vperm.slane %v1209_v4, 0 }
  0xbf   :  { %v78_v48 = vmul.f32 %v1554_v18, %v62_v57 }
  0xc0   :  { %v350_v58 = vpack.c.bf16 %v165_v36, %v135_v26  ;;  %v351_v59 = vpack.c.bf16 %v166_v55, %v136_v8 }
  0xc1   :  { %v349_v63 = vpack.c.bf16 %v108_v19, %v78_v48 }
  0xc2   :  { %390 = vmatpush.bf16.msra.mxu0 %v350_v58  ;;  %403 = vmatpush.bf16.msra.mxu1 %v351_v59 }
  0xc3   :  { %430 = vmatpush.bf16.msra.mxu3 %v349_v63 }
  0xc4   :  { %v52_v34 = vpop.permute.xlu0 %51 }
  0xc5   :  { %v64_v35 = vsel %vm61_vm7, %v52_v34, %v54_v25  ;;  %v65_v26 = vsel %vm61_vm7, %v58_v30, %v52_v34  ;;  %v84_v27 = vpop.permute.xlu1 %83 }
  0xc6   :  { %v75_v8 = vmul.f32 %v1552_v6, %v65_v26  ;;  %v76_v36 = vmul.f32 %v1553_v9, %v64_v35  ;;  %v94_v55 = vsel %vm91_vm8, %v84_v27, %v86_v45  ;;  %v95_v57 = vsel %vm91_vm8, %v90_v62, %v84_v27  ;;  %860 = vmatmul.msk.bf16.vlgmr.msra.gmra.mxu3 %vm367_vm9, %v366_v60 }
  0xc7   :  { %v105_v25 = vmul.f32 %v1550_v7, %v95_v57  ;;  %v106_v30 = vmul.f32 %v1551_v24, %v94_v55 }
  0xc9   :  { %v346_v19 = vpack.c.bf16 %v105_v25, %v75_v8  ;;  %v347_v48 = vpack.c.bf16 %v106_v30, %v76_v36 }
  0xcb   :  { %391 = vmatpush.bf16.msra.mxu0 %v346_v19  ;;  %404 = vmatpush.bf16.msra.mxu1 %v347_v48 }
  0xce   :  { %857 = vmatmul.msk.bf16.vlgmr.msra.gmra.mxu0 %vm367_vm9, %v366_v60  ;;  %858 = vmatmul.msk.bf16.vlgmr.msra.gmra.mxu1 %vm367_vm9, %v366_v60  ;;  %v890_v60 = vmov 0  }
  0xcf   :  { %876 = vset.pattern.permute.xlu1 %v890_v60  ;;  %877 = vset.pattern.permute.xlu0 %v890_v60 }
 0x141   :  { %v419_v45 = vpop.f32.mrf.mxu2 }
 0x142   :  { %v444_v34 = vmul.f32 %v419_v45, %v419_v45 }
 0x149   :  { %v432_v58 = vpop.f32.mrf.mxu3  ;;  %v421_v59 = vpop.f32.mrf.mxu2 }
 0x14a   :  { %v445_v7 = vmul.f32 %v432_v58, %v432_v58 }
 0x14b   :  { %v393_v62 = vpop.f32.mrf.mxu0  ;;  %v406_v63 = vpop.f32.mrf.mxu1 }
 0x14c   :  { %v442_v35 = vmul.f32 %v393_v62, %v393_v62  ;;  %v436_v26 = vadd.f32 %v406_v63, %v393_v62  ;;  %v443_v27 = vmul.f32 %v406_v63, %v406_v63 }
 0x14e   :  { %v437_v57 = vadd.f32 %v436_v26, %v419_v45  ;;  %v446_v55 = vadd.f32 %v443_v27, %v442_v35 }
 0x150   :  { %v438_v8 = vadd.f32 %v437_v57, %v432_v58  ;;  %v447_v36 = vadd.f32 %v446_v55, %v444_v34 }
 0x151   :  { %v434_v25 = vpop.f32.mrf.mxu3 }
 0x152   :  { %439 = vadd.xlane.f32.xlu2 %v438_v8  ;;  %v448_v30 = vadd.f32 %v447_v36, %v445_v7  ;;  %v454_v7 = vld [vmem:[%s1544_s3] sm:$0xff] }
 0x153   :  { %v395_v19 = vpop.f32.mrf.mxu0  ;;  %v408_v48 = vpop.f32.mrf.mxu1 }
 0x154   :  { %449 = vadd.xlane.f32.xlu0 %v448_v30 }
 0x1c5   :  { %v440_v59 = vpop.xlane.xlu2 %439 }
 0x1c6   :  { %v441_v24 = vmul.f32 0.001953125, %v440_v59 }
 0x1c7   :  { %v450_v6 = vpop.xlane.xlu0 %449 }
 0x1c8   :  { %v452_v9 = vmul.f32 %v441_v24, %v441_v24  ;;  %v451_v18 = vmul.f32 0.001953125, %v450_v6 }
 0x1ca   :  { %v453_v16 = vsub.f32 %v451_v18, %v452_v9 }
 0x1cc   :  { %v455_v26 = vadd.f32 1e-05, %v453_v16  ;;  %v467_v16 = vld [vmem:[%s1545_s4] sm:$0xff] }
 0x1ce   :  { %878 = vrsqrt.f32 %v455_v26  ;;  %vm462_vm11 = vweird.f32 %v455_v26 }
 0x1d4   :  { %v879_v35 = vpop.eup %878 }
 0x1d5   :  { %v457_v27 = vmul.f32 %v879_v35, %v455_v26  ;;  %vm463_vm10 = vweird.f32 %v879_v35 }
 0x1d6   :  { %vm464_vm12 = vmor %vm462_vm11, %vm463_vm10 }
 0x1d7   :  { %v458_v34 = vmul.f32 %v879_v35, %v457_v27 }
 0x1d9   :  { %v459_v57 = vmul.f32 0.5, %v458_v34 }
 0x1db   :  { %v460_v55 = vsub.f32 1.5, %v459_v57 }
 0x1dd   :  { %v461_v8 = vmul.f32 %v879_v35, %v460_v55 }
 0x1df   :  { %v465_v36 = vsel %vm464_vm12, %v879_v35, %v461_v8 }
 0x1e0   :  { %v466_v25 = vmul.f32 %v465_v36, %v454_v7 }
 0x1e2   :  { %472 = vperm.xlu1 %876, %v466_v25   ;;  %v468_v6 = vmul.f32 %v466_v25, %v441_v24 }
 0x1e4   :  { %v469_v18 = vsub.f32 %v467_v16, %v468_v6 }
 0x1ea   :  { %481 = vperm.xlu1 %876, %v469_v18  }
 0x254   :  { %v473_v9 = vpop.permute.xlu1 %472 }
 0x255   :  { %v476_v30 = vmul.f32 %v473_v9, %v406_v63  ;;  %v477_v19 = vmul.f32 %v473_v9, %v419_v45  ;;  %v478_v48 = vmul.f32 %v473_v9, %v432_v58  ;;  %v475_v24 = vmul.f32 %v473_v9, %v393_v62 }
 0x25c   :  { %v482_v60 = vpop.permute.xlu1 %481 }
 0x25d   :  { %v485_v59 = vadd.f32 %v482_v60, %v476_v30  ;;  %v486_v26 = vadd.f32 %v482_v60, %v477_v19  ;;  %v487_v27 = vadd.f32 %v482_v60, %v478_v48  ;;  %v484_v45 = vadd.f32 %v482_v60, %v475_v24 }
 0x25f   :  { %v1288_v34 = vmax.f32 %v485_v59, 0.0  ;;  %v1290_v35 = vmax.f32 %v486_v26, 0.0  ;;  %v1292_v57 = vmax.f32 %v487_v27, 0.0  ;;  %v1300_v58 = vmax.f32 %v484_v45, 0.0 }
 0x261   :  { %606 = vrot.lane.b32.xlu0 %v1292_v57, %s882_s9  ;;  %644 = vrot.lane.b32.xlu1 %v1290_v35, %s883_s10 }
 0x262   :  { %642 = vrot.lane.b32.xlu2 %v1288_v34, %s883_s10 }
 0x269   :  { %646 = vrot.lane.b32.xlu1 %v1292_v57, %s883_s10  ;;  %620 = vrot.lane.b32.xlu0 %v1300_v58, %s884_s15 }
 0x26a   :  { %600 = vrot.lane.b32.xlu2 %v1300_v58, %s882_s9 }
 0x271   :  { %602 = vrot.lane.b32.xlu0 %v1288_v34, %s882_s9  ;;  %640 = vrot.lane.b32.xlu1 %v1300_v58, %s883_s10 }
 0x272   :  { %586 = vrot.lane.b32.xlu2 %v1292_v57, %s885_s0 }
 0x279   :  { %534 = vrot.lane.b32.xlu0 %v1288_v34, %s886_s16  ;;  %604 = vrot.lane.b32.xlu1 %v1290_v35, %s882_s9 }
 0x27a   :  { %580 = vrot.lane.b32.xlu2 %v1300_v58, %s885_s0 }
 0x281   :  { %556 = vrot.lane.b32.xlu0 %v1290_v35, %s887_s17  ;;  %624 = vrot.lane.b32.xlu1 %v1290_v35, %s884_s15 }
 0x282   :  { %554 = vrot.lane.b32.xlu2 %v1288_v34, %s887_s17 }
 0x289   :  { %558 = vrot.lane.b32.xlu0 %v1292_v57, %s887_s17  ;;  %626 = vrot.lane.b32.xlu1 %v1292_v57, %s884_s15 }
 0x28a   :  { %538 = vrot.lane.b32.xlu2 %v1292_v57, %s886_s16 }
 0x291   :  { %514 = vrot.lane.b32.xlu0 %v1288_v34, %s889_s19  ;;  %584 = vrot.lane.b32.xlu1 %v1290_v35, %s885_s0 }
 0x292   :  { %496 = vrot.lane.b32.xlu2 %v1290_v35, %s888_s18 }
 0x299   :  { %552 = vrot.lane.b32.xlu0 %v1300_v58, %s887_s17  ;;  %622 = vrot.lane.b32.xlu1 %v1288_v34, %s884_s15 }
 0x29a   :  { %532 = vrot.lane.b32.xlu2 %v1300_v58, %s886_s16 }
 0x2a1   :  { %492 = vrot.lane.b32.xlu0 %v1300_v58, %s888_s18  ;;  %536 = vrot.lane.b32.xlu1 %v1290_v35, %s886_s16 }
 0x2a2   :  { %518 = vrot.lane.b32.xlu2 %v1292_v57, %s889_s19 }
 0x2a9   :  { %582 = vrot.lane.b32.xlu1 %v1288_v34, %s885_s0 }
 0x2b1   :  { %494 = vrot.lane.b32.xlu1 %v1288_v34, %s888_s18 }
 0x2b9   :  { %516 = vrot.lane.b32.xlu1 %v1290_v35, %s889_s19 }
 0x2bc   :  { %v643_v62 = vpop.permute.xlu2 %642 }
 0x2c1   :  { %498 = vrot.lane.b32.xlu1 %v1292_v57, %s888_s18 }
 0x2c4   :  { %v601_v30 = vpop.permute.xlu2 %600 }
 0x2c9   :  { %512 = vrot.lane.b32.xlu1 %v1300_v58, %s889_s19 }
 0x2d3   :  { %v607_v63 = vpop.permute.xlu0 %606  ;;  %v645_v55 = vpop.permute.xlu1 %644 }
 0x2d4   :  { %v649_v7 = vsel %vm288_vm0, %v643_v62, %v645_v55  ;;  %v611_v10 = vsel %vm228_vm2, %v607_v63, %v601_v30 }
 0x2d5   :  { %v653_v8 = vmul.f32 %v649_v7, %v295_v14 }
 0x2d7   :  { %v713_v36 = vpack.c.bf16 %v653_v8, %v653_v8 }
 0x2d9   :  { %v724_v25 = vsel %vm371_vm1, %v713_v36, 0 }
 0x2da   :  { %748 = vmatpush.bf16.msrb.mxu1 %v724_v25 }
 0x2db   :  { %v647_v6 = vpop.permute.xlu1 %646  ;;  %v621_v9 = vpop.permute.xlu0 %620 }
 0x2dc   :  { %v648_v16 = vsel %vm288_vm0, %v645_v55, %v647_v6  ;;  %v587_v55 = vpop.permute.xlu2 %586 }
 0x2dd   :  { %v654_v18 = vmul.f32 %v648_v16, %v296_v12 }
 0x2df   :  { %v714_v19 = vpack.c.bf16 %v654_v18, %v654_v18 }
 0x2e1   :  { %v727_v48 = vsel %vm371_vm1, %v714_v19, 0 }
 0x2e2   :  { %761 = vmatpush.bf16.msrb.mxu2 %v727_v48 }
 0x2e3   :  { %v641_v60 = vpop.permute.xlu1 %640  ;;  %v603_v12 = vpop.permute.xlu0 %602 }
 0x2e4   :  { %v650_v14 = vsel %vm288_vm0, %v641_v60, %v643_v62  ;;  %v651_v59 = vsel %vm288_vm0, %v647_v6, %v641_v60  ;;  %v1382_v25 = vpop.permute.xlu2 %580  ;;  %v615_v60 = vmul.f32 %v611_v10, %v237_v47  ;;  %v575_v47 = vmul.f32 %v1292_v57, %v177_v54 }
 0x2e5   :  { %v652_v26 = vmul.f32 %v650_v14, %v294_v13  ;;  %v655_v27 = vmul.f32 %v651_v59, %v297_v15  ;;  %v591_v18 = vsel %vm198_vm4, %v587_v55, %v1382_v25  ;;  %v610_v54 = vsel %vm228_vm2, %v601_v30, %v603_v12 }
 0x2e7   :  { %v712_v24 = vpack.c.bf16 %v652_v26, %v652_v26  ;;  %v715_v45 = vpack.c.bf16 %v655_v27, %v655_v27  ;;  %v595_v27 = vmul.f32 %v591_v18, %v207_v52  ;;  %v574_v52 = vmul.f32 %v1290_v35, %v176_v50 }
 0x2e8   :  { %v612_v18 = vmul.f32 %v610_v54, %v234_v0 }
 0x2e9   :  { %v721_v7 = vsel %vm371_vm1, %v712_v24, 0  ;;  %v730_v8 = vsel %vm371_vm1, %v715_v45, 0 }
 0x2ea   :  { %735 = vmatpush.bf16.msrb.mxu0 %v721_v7  ;;  %774 = vmatpush.bf16.msrb.mxu3 %v730_v8  ;;  %v707_v8 = vpack.c.bf16 %v595_v27, %v575_v47  ;;  %v573_v47 = vmul.f32 %v1288_v34, %v175_v41 }
 0x2eb   :  { %v605_v62 = vpop.permute.xlu1 %604  ;;  %v1380_v36 = vpop.permute.xlu0 %534 }
 0x2ec   :  { %v608_v13 = vsel %vm228_vm2, %v605_v62, %v607_v63  ;;  %v555_v14 = vpop.permute.xlu2 %554  ;;  %v609_v57 = vsel %vm228_vm2, %v603_v12, %v605_v62 }
 0x2ed   :  { %v614_v59 = vmul.f32 %v608_v13, %v236_v33  ;;  %v613_v50 = vmul.f32 %v609_v57, %v235_v17 }
 0x2f3   :  { %v625_v6 = vpop.permute.xlu1 %624  ;;  %v557_v15 = vpop.permute.xlu0 %556 }
 0x2f4   :  { %v539_v10 = vpop.permute.xlu2 %538 }
 0x2fb   :  { %v627_v16 = vpop.permute.xlu1 %626 }
 0x2fc   :  { %v628_v19 = vsel %vm258_vm3, %v625_v6, %v627_v16  ;;  %v631_v48 = vsel %vm258_vm3, %v627_v16, %v621_v9 }
 0x2fd   :  { %v634_v63 = vmul.f32 %v628_v19, %v266_v38  ;;  %v635_v26 = vmul.f32 %v631_v48, %v267_v53  ;;  %v559_v38 = vpop.permute.xlu0 %558 }
 0x2fe   :  { %v560_v23 = vsel %vm151_vm6, %v557_v15, %v559_v38 }
 0x2ff   :  { %v710_v24 = vpack.c.bf16 %v634_v63, %v614_v59  ;;  %v711_v45 = vpack.c.bf16 %v635_v26, %v615_v60 }
 0x301   :  { %762 = vmatpush.bf16.msrb.mxu2 %v710_v24  ;;  %775 = vmatpush.bf16.msrb.mxu3 %v711_v45 }
 0x303   :  { %v585_v7 = vpop.permute.xlu1 %584 }
 0x304   :  { %v588_v33 = vsel %vm198_vm4, %v585_v7, %v587_v55 }
 0x305   :  { %v594_v53 = vmul.f32 %v588_v33, %v206_v56  ;;  %776 = vmatpush.bf16.msrb.mxu3 %v707_v8  ;;  %v1431_v12 = vpop.permute.xlu0 %514  ;;  %v716_v33 = vld [vmem:[%s1546_s5] sm:$0xf] }
 0x307   :  { %v706_v13 = vpack.c.bf16 %v594_v53, %v574_v52 }
 0x309   :  { %763 = vmatpush.bf16.msrb.mxu2 %v706_v13 }
 0x30b   :  { %v623_v16 = vpop.permute.xlu1 %622 }
 0x30c   :  { %v629_v55 = vsel %vm258_vm3, %v623_v16, %v625_v6  ;;  %v630_v56 = vsel %vm258_vm3, %v621_v9, %v623_v16  ;;  %v497_v6 = vpop.permute.xlu2 %496  ;;  %v561_v9 = vsel %vm151_vm6, %v555_v14, %v557_v15 }
 0x30d   :  { %v632_v35 = vmul.f32 %v630_v56, %v264_v20  ;;  %v633_v30 = vmul.f32 %v629_v55, %v265_v21  ;;  %v566_v20 = vmul.f32 %v561_v9, %v159_v44  ;;  %v567_v21 = vmul.f32 %v560_v23, %v160_v2  ;;  %v553_v63 = vpop.permute.xlu0 %552 }
 0x30e   :  { %v562_v24 = vsel %vm151_vm6, %v553_v63, %v555_v14  ;;  %v563_v44 = vsel %vm151_vm6, %v559_v38, %v553_v63  ;;  %v572_v14 = vmul.f32 %v1300_v58, %v174_v40  ;;  %v1561_v23 = vperm.slane %v1209_v4, 1 }
 0x30f   :  { %v708_v62 = vpack.c.bf16 %v632_v35, %v612_v18  ;;  %v709_v19 = vpack.c.bf16 %v633_v30, %v613_v50  ;;  %v565_v46 = vmul.f32 %v562_v24, %v158_v3  ;;  %v1558_v35 = vperm.slane %v1204_v28, 1 }
 0x311   :  { %736 = vmatpush.bf16.msrb.mxu0 %v708_v62  ;;  %749 = vmatpush.bf16.msrb.mxu1 %v709_v19  ;;  %v1559_v62 = vperm.slane %v1204_v28, 0 }
 0x313   :  { %v537_v0 = vpop.permute.xlu1 %536 }
 0x314   :  { %v540_v17 = vsel %vm121_vm5, %v537_v0, %v539_v10  ;;  %v541_v29 = vsel %vm121_vm5, %v1380_v36, %v537_v0  ;;  %v533_v26 = vpop.permute.xlu2 %532 }
 0x315   :  { %v546_v48 = vmul.f32 %v541_v29, %v129_v42  ;;  %v547_v15 = vmul.f32 %v540_v17, %v130_v22  ;;  %v493_v57 = vpop.permute.xlu0 %492 }
 0x317   :  { %v702_v60 = vpack.c.bf16 %v566_v20, %v546_v48  ;;  %v703_v59 = vpack.c.bf16 %v567_v21, %v547_v15 }
 0x319   :  { %764 = vmatpush.bf16.msrb.mxu2 %v702_v60  ;;  %777 = vmatpush.bf16.msrb.mxu3 %v703_v59 }
 0x31b   :  { %v583_v27 = vpop.permute.xlu1 %582 }
 0x31c   :  { %v589_v2 = vsel %vm198_vm4, %v583_v27, %v585_v7  ;;  %v590_v42 = vsel %vm198_vm4, %v1382_v25, %v583_v27  ;;  %v542_v7 = vsel %vm121_vm5, %v533_v26, %v1380_v36  ;;  %v543_v25 = vsel %vm121_vm5, %v539_v10, %v533_v26  ;;  %v519_v36 = vpop.permute.xlu2 %518 }
 0x31d   :  { %v592_v22 = vmul.f32 %v590_v42, %v204_v49  ;;  %v593_v45 = vmul.f32 %v589_v2, %v205_v51  ;;  %v564_v49 = vmul.f32 %v563_v44, %v157_v1  ;;  %v544_v43 = vmul.f32 %v543_v25, %v127_v61 }
 0x31e   :  { %v545_v40 = vmul.f32 %v542_v7, %v128_v5 }
 0x31f   :  { %v704_v51 = vpack.c.bf16 %v592_v22, %v572_v14  ;;  %v705_v8 = vpack.c.bf16 %v593_v45, %v573_v47  ;;  %v700_v34 = vpack.c.bf16 %v564_v49, %v544_v43 }
 0x320   :  { %v701_v58 = vpack.c.bf16 %v565_v46, %v545_v40 }
 0x321   :  { %737 = vmatpush.bf16.msrb.mxu0 %v704_v51  ;;  %750 = vmatpush.bf16.msrb.mxu1 %v705_v8 }
 0x323   :  { %v495_v41 = vpop.permute.xlu1 %494 }
 0x324   :  { %v501_v1 = vsel %vm61_vm7, %v495_v41, %v497_v6  ;;  %v502_v16 = vsel %vm61_vm7, %v493_v57, %v495_v41 }
 0x325   :  { %738 = vmatpush.bf16.msrb.mxu0 %v700_v34  ;;  %751 = vmatpush.bf16.msrb.mxu1 %v701_v58  ;;  %v506_v61 = vmul.f32 %v501_v1, %v69_v31  ;;  %v1556_v31 = vperm.slane %v1209_v4, 3  ;;  %v505_v30 = vmul.f32 %v502_v16, %v1558_v35  ;;  %v802_v34 = vld [vmem:[%s1547_s6] sm:$0xff] }
 0x32b   :  { %v517_v39 = vpop.permute.xlu1 %516 }
 0x32c   :  { %v521_v3 = vsel %vm91_vm8, %v1431_v12, %v517_v39  ;;  %v520_v38 = vsel %vm91_vm8, %v517_v39, %v519_v36 }
 0x32d   :  { %v526_v37 = vmul.f32 %v521_v3, %v99_v32  ;;  %v527_v10 = vmul.f32 %v520_v38, %v1556_v31  ;;  %v1557_v32 = vperm.slane %v1204_v28, 3 }
 0x32f   :  { %v698_v5 = vpack.c.bf16 %v526_v37, %v506_v61  ;;  %v815_v61 = vld [vmem:[%s1548_s7] sm:$0xff] }
 0x331   :  { %765 = vmatpush.bf16.msrb.mxu2 %v698_v5 }
 0x333   :  { %v499_v53 = vpop.permute.xlu1 %498 }
 0x334   :  { %v500_v52 = vsel %vm61_vm7, %v497_v6, %v499_v53  ;;  %863 = vmatmul.msk.bf16.vlgmr.msrb.gmra.mxu2 %vm367_vm9, %v716_v33  ;;  %v503_v55 = vsel %vm61_vm7, %v499_v53, %v493_v57  ;;  %v1560_v6 = vperm.slane %v1209_v4, 0 }
 0x335   :  { %v507_v13 = vmul.f32 %v500_v52, %v1557_v32  ;;  %v504_v19 = vmul.f32 %v503_v55, %v1559_v62 }
 0x337   :  { %v699_v54 = vpack.c.bf16 %v527_v10, %v507_v13 }
 0x339   :  { %778 = vmatpush.bf16.msrb.mxu3 %v699_v54 }
 0x33b   :  { %v513_v56 = vpop.permute.xlu1 %512 }
 0x33c   :  { %v522_v18 = vsel %vm91_vm8, %v513_v56, %v1431_v12  ;;  %v523_v50 = vsel %vm91_vm8, %v519_v36, %v513_v56  ;;  %864 = vmatmul.msk.bf16.vlgmr.msrb.gmra.mxu3 %vm367_vm9, %v716_v33 }
 0x33d   :  { %v524_v9 = vmul.f32 %v523_v50, %v1560_v6  ;;  %v525_v0 = vmul.f32 %v522_v18, %v1561_v23 }
 0x33f   :  { %v696_v17 = vpack.c.bf16 %v524_v9, %v504_v19  ;;  %v697_v29 = vpack.c.bf16 %v525_v0, %v505_v30 }
 0x341   :  { %739 = vmatpush.bf16.msrb.mxu0 %v696_v17  ;;  %752 = vmatpush.bf16.msrb.mxu1 %v697_v29 }
 0x344   :  { %861 = vmatmul.msk.bf16.vlgmr.msrb.gmra.mxu0 %vm367_vm9, %v716_v33  ;;  %862 = vmatmul.msk.bf16.vlgmr.msrb.gmra.mxu1 %vm367_vm9, %v716_v33 }
 0x3b7   :  { %v767_v11 = vpop.f32.mrf.mxu2 }
 0x3b8   :  { %v792_v48 = vmul.f32 %v767_v11, %v767_v11 }
 0x3bf   :  { %v780_v12 = vpop.f32.mrf.mxu3  ;;  %v769_v20 = vpop.f32.mrf.mxu2 }
 0x3c0   :  { %v793_v4 = vmul.f32 %v780_v12, %v780_v12 }
 0x3c1   :  { %v741_v21 = vpop.f32.mrf.mxu0  ;;  %v754_v28 = vpop.f32.mrf.mxu1 }
 0x3c2   :  { %v790_v15 = vmul.f32 %v741_v21, %v741_v21  ;;  %v784_v60 = vadd.f32 %v754_v28, %v741_v21  ;;  %v791_v59 = vmul.f32 %v754_v28, %v754_v28 }
 0x3c4   :  { %v785_v63 = vadd.f32 %v784_v60, %v767_v11  ;;  %v794_v26 = vadd.f32 %v791_v59, %v790_v15 }
 0x3c6   :  { %v786_v27 = vadd.f32 %v785_v63, %v780_v12  ;;  %v795_v24 = vadd.f32 %v794_v26, %v792_v48 }
 0x3c7   :  { %v782_v44 = vpop.f32.mrf.mxu3 }
 0x3c8   :  { %787 = vadd.xlane.f32.xlu2 %v786_v27  ;;  %v796_v2 = vadd.f32 %v795_v24, %v793_v4 }
 0x3c9   :  { %v743_v42 = vpop.f32.mrf.mxu0  ;;  %v756_v22 = vpop.f32.mrf.mxu1 }
 0x3ca   :  { %797 = vadd.xlane.f32.xlu0 %v796_v2 }
 0x43b   :  { %v788_v45 = vpop.xlane.xlu2 %787 }
 0x43c   :  { %v789_v14 = vmul.f32 0.001953125, %v788_v45 }
 0x43d   :  { %v798_v47 = vpop.xlane.xlu0 %797 }
 0x43e   :  { %v800_v7 = vmul.f32 %v789_v14, %v789_v14  ;;  %v799_v25 = vmul.f32 0.001953125, %v798_v47 }
 0x440   :  { %v801_v49 = vsub.f32 %v799_v25, %v800_v7 }
 0x442   :  { %v803_v46 = vadd.f32 1e-05, %v801_v49 }
 0x444   :  { %880 = vrsqrt.f32 %v803_v46  ;;  %vm810_vm14 = vweird.f32 %v803_v46 }
 0x44a   :  { %v881_v51 = vpop.eup %880 }
 0x44b   :  { %v805_v8 = vmul.f32 %v881_v51, %v803_v46  ;;  %vm811_vm13 = vweird.f32 %v881_v51 }
 0x44c   :  { %vm812_vm15 = vmor %vm810_vm14, %vm811_vm13 }
 0x44d   :  { %v806_v43 = vmul.f32 %v881_v51, %v805_v8 }
 0x44f   :  { %v807_v40 = vmul.f32 0.5, %v806_v43 }
 0x451   :  { %v808_v41 = vsub.f32 1.5, %v807_v40 }
 0x453   :  { %v809_v58 = vmul.f32 %v881_v51, %v808_v41 }
 0x455   :  { %v813_v1 = vsel %vm812_vm15, %v881_v51, %v809_v58 }
 0x456   :  { %v814_v39 = vmul.f32 %v813_v1, %v802_v34 }
 0x458   :  { %820 = vperm.xlu1 %876, %v814_v39   ;;  %v816_v3 = vmul.f32 %v814_v39, %v789_v14 }
 0x45a   :  { %v817_v37 = vsub.f32 %v815_v61, %v816_v3 }
 0x460   :  { %829 = vperm.xlu1 %876, %v817_v37  }
 0x4ca   :  { %v821_v5 = vpop.permute.xlu1 %820 }
 0x4cb   :  { %v823_v36 = vmul.f32 %v821_v5, %v741_v21  ;;  %v824_v33 = vmul.f32 %v821_v5, %v754_v28  ;;  %v825_v38 = vmul.f32 %v821_v5, %v767_v11  ;;  %v826_v53 = vmul.f32 %v821_v5, %v780_v12 }
 0x4d2   :  { %v830_v52 = vpop.permute.xlu1 %829 }
 0x4d3   :  { %v832_v31 = vadd.f32 %v830_v52, %v823_v36  ;;  %v833_v10 = vadd.f32 %v830_v52, %v824_v33  ;;  %v834_v32 = vadd.f32 %v830_v52, %v825_v38  ;;  %v835_v13 = vadd.f32 %v830_v52, %v826_v53 }
 0x4d5   :  { %v836_v54 = vmax.f32 %v832_v31, 0.0  ;;  %v837_v57 = vmax.f32 %v833_v10, 0.0  ;;  %v838_v16 = vmax.f32 %v834_v32, 0.0  ;;  %v839_v55 = vmax.f32 %v835_v13, 0.0 }
 0x4d7   :  { %840 = vst [vmem:[%s1549_s8] sm:$0xff] %v836_v54 }
 0x4d8   :  { %841 = vst [vmem:[%s1549_s8 + $0x8] sm:$0xff] %v837_v57 }
 0x4d9   :  { %865 = vst [vmem:[%s1549_s8 + $0x10] sm:$0xff] %v838_v16 }
 0x4da   :  { %866 = vst [vmem:[%s1549_s8 + $0x18] sm:$0xff] %v839_v55 }

</bundles_post_ra>
